<compile_context>
chip_gen: v7x
topology: tpu7x:2x2x1
jax: 0.10.0
libtpu: 0.0.40
codegen_flags: <defaults>
</compile_context>

<pallas_src>
import jax
import jax.numpy as jnp
from jax import lax
from jax.experimental import pallas as pl
from jax.experimental.pallas import tpu as pltpu


def _round_up(n, m):
    return ((n + m - 1) // m) * m


def _cdiv(a, b):
    return (a + b - 1) // b


def _vmem_capacity_bytes():
    """Physical VMEM per TensorCore; conservative fallback if unqueryable."""
    try:
        info = pltpu.get_tpu_info()
        cap = int(getattr(info, "vmem_capacity_bytes", 0))
        if cap > 0:
            return cap
    except Exception:
        pass
    return 64 * 1024 * 1024  # v7x per-TC VMEM: safe lower bound everywhere


def _choose_tiles(batch, features, itemsize, budget_bytes):
    """Pick (TB, TK, num_k) from a VMEM byte budget (lane-padding aware)."""
    f_lanes = _round_up(features, 128)

    # Only K-tile when the lane-padded feature dim is very wide; otherwise a
    # single full-F block keeps the kernel a pure streaming mat-vec.
    tk_cap = 8192
    if f_lanes <= tk_cap:
        tk, tk_lanes, num_k = features, f_lanes, 1
    else:
        tk, tk_lanes = tk_cap, tk_cap
        num_k = _cdiv(features, tk)

    # Fixed VMEM: resident weight (double-buffered, 8-sublane padded) + slack.
    fixed = 2 * 8 * tk_lanes * 4 + (256 << 10)
    # Per batch row: double-buffered x tile + two (1,TB) out bufs + acc scratch
    # (the (1,TB) rows are padded to 8 sublanes of f32).
    per_row = 2 * tk_lanes * itemsize + 3 * 8 * 4

    tb = max(128, ((budget_bytes - fixed) // per_row) // 128 * 128)
    tb = min(tb, _round_up(batch, 128))

    # Keep >= 2 batch tiles when possible so both v7x TensorCores get work.
    if batch > 128 and tb >= _round_up(batch, 128):
        tb = max(128, _round_up(_cdiv(batch, 2), 128))
    return tb, tk, num_k


def _make_svm_kernel(num_k, tk, features):
    rem = features - (num_k - 1) * tk        # valid columns in the last K block
    mask_last_k = (num_k > 1) and (rem != tk)

    def kernel(x_ref, w_ref, b_ref, o_ref, acc_ref):
        # x_ref: (TB, TK) VMEM; w_ref: (1, TK) VMEM (resident); b_ref: (1,1) SMEM
        # o_ref: (1, TB) lane-dense output; acc_ref: (1, TB) f32 scratch
        k = pl.program_id(1)

        @pl.when(k == 0)
        def _init():
            acc_ref[...] = jnp.zeros_like(acc_ref)

        x = x_ref[...]
        if mask_last_k:
            # Stale VMEM beyond column `rem` of the ragged last K block must
            # not reach the accumulator (weight is zero-padded in HBM, but
            # 0 * NaN would still poison the sum).
            col = lax.broadcasted_iota(jnp.int32, x.shape, 1)
            valid = jnp.where(k == num_k - 1, rem, tk)
            x = jnp.where(col < valid, x, jnp.zeros_like(x))

        acc_ref[...] += lax.dot_general(
            w_ref[...],                       # (1, TK)
            x,                                # (TB, TK)
            dimension_numbers=(((1,), (1,)), ((), ())),
            preferred_element_type=jnp.float32,
        )                                     # -> (1, TB), lane-dense

        @pl.when(k == num_k - 1)
        def _finalize():
            o_ref[...] = (acc_ref[...] + b_ref[0, 0]).astype(o_ref.dtype)

    return kernel


def binary_svm_forward(x, weight, bias):
    """x: (B, F); weight: (1, F) (PyTorch layout); bias: (1,).

    Returns `linear(x).squeeze()`: shape (B,) for B > 1, scalar for B == 1.
    """
    B, F = x.shape
    itemsize = jnp.dtype(x.dtype).itemsize

    vmem_cap = _vmem_capacity_bytes()
    budget = (vmem_cap * 3) // 4                          # ~48 MiB v7x, ~96 MiB v5e/v6e
    vmem_limit = int(min(vmem_cap - (4 << 20), (vmem_cap * 7) // 8))

    TB, TK, num_k = _choose_tiles(B, F, itemsize, budget)
    num_b = _cdiv(B, TB)
    B_out = num_b * TB                                    # padded lane-dense output only

    # Weight stays (1, F): lane-dense, resident, no wrapper transpose.
    # Zero-pad the (tiny) weight along F when K is tiled so every weight
    # block is fully in-bounds.
    w = weight.reshape(1, F).astype(x.dtype)
    if num_k * TK != F:
        w = jnp.pad(w, ((0, 0), (0, num_k * TK - F)))
    b = bias.reshape(1, 1).astype(jnp.float32)            # scalar, lives in SMEM

    cost = pl.CostEstimate(
        flops=2 * B * F,
        transcendentals=0,
        bytes_accessed=itemsize * B * F + 4 * F + 4 * B,
    )

    out = pl.pallas_call(
        _make_svm_kernel(num_k, TK, F),
        out_shape=jax.ShapeDtypeStruct((1, B_out), x.dtype),
        grid_spec=pltpu.PrefetchScalarGridSpec(
            num_scalar_prefetch=0,
            grid=(num_b, num_k),
            in_specs=[
                pl.BlockSpec((TB, TK), lambda i, k: (i, k)),        # x stream
                pl.BlockSpec((1, TK), lambda i, k: (0, k)),         # weight
                pl.BlockSpec((1, 1), lambda i, k: (0, 0),
                             memory_space=pltpu.MemorySpace.SMEM),  # bias scalar
            ],
            out_specs=pl.BlockSpec((1, TB), lambda i, k: (0, i)),   # lane-dense
            scratch_shapes=[pltpu.VMEM((1, TB), jnp.float32)],      # f32 accumulator
        ),
        compiler_params=pltpu.CompilerParams(
            dimension_semantics=("parallel", "arbitrary"),
            vmem_limit_bytes=vmem_limit,
        ),
        cost_estimate=cost,
    )(x, w, b)

    result = out.reshape(B_out)[:B]
    if B == 1:
        # torch .squeeze() on (1, 1) yields a 0-d tensor
        result = result.reshape(())
    return result


if __name__ == "__main__":
    key = jax.random.PRNGKey(0)
    k_x, k_w, k_b = jax.random.split(key, 3)

    batch = 8
    n_features = 32

    # Deterministic "PyTorch-style" init: U(-1/sqrt(F), 1/sqrt(F))
    bound = 1.0 / jnp.sqrt(jnp.float32(n_features))
    weight = jax.random.uniform(k_w, (1, n_features), jnp.float32, -bound, bound)
    bias = jax.random.uniform(k_b, (1,), jnp.float32, -bound, bound)

    x = jax.random.normal(k_x, (batch, n_features), jnp.float32)

    out = binary_svm_forward(x, weight, bias)
    jax.block_until_ready(out)

    # sanity check vs plain JAX reference
    ref = (x @ weight.T + bias).reshape(batch)
    assert out.shape == (batch,)
    assert jnp.allclose(out, ref, atol=1e-5, rtol=1e-5)

    print("KERNEL_OK")
</pallas_src>

<mosaic_0001>
module attributes {stable_mosaic.version = 11 : i64} {
  func.func @kernel(%arg0: i32, %arg1: i32, %arg2: memref<128x32xf32, #tpu.memory_space<vmem>>, %arg3: memref<1x32xf32, #tpu.memory_space<vmem>>, %arg4: memref<1x1xf32, #tpu.memory_space<smem>>, %arg5: memref<1x128xf32, #tpu.memory_space<vmem>>, %arg6: memref<1x128xf32, #tpu.memory_space<vmem>>) attributes {dimension_semantics = [#tpu.dimension_semantics<parallel>, #tpu.dimension_semantics<arbitrary>], iteration_bounds = array<i64: 1, 1>, scalar_prefetch = 0 : i64, scratch_operands = 1 : i64, tpu.core_type = #tpu.core_type<tc>, window_params = [{transform_indices = @transform_0, window_bounds = array<i64: 128, 32>}, {transform_indices = @transform_1, window_bounds = array<i64: 1, 32>}, {transform_indices = @transform_2, window_bounds = array<i64: 1, 1>}, {transform_indices = @transform_3, window_bounds = array<i64: 1, 128>}]} {
    %c0_i32 = arith.constant 0 : i32
    %0 = arith.cmpi eq, %arg1, %c0_i32 : i32
    %1 = arith.extui %0 : i1 to i32
    %c0_i32_0 = arith.constant 0 : i32
    %2 = arith.cmpi ne, %1, %c0_i32_0 : i32
    scf.if %2 {
      %cst_10 = arith.constant 0.000000e+00 : f32
      %12 = vector.broadcast %cst_10 : f32 to vector<1x128xf32>
      %c0_11 = arith.constant 0 : index
      %c0_12 = arith.constant 0 : index
      %13 = vector.load %arg6[%c0_11, %c0_12] : memref<1x128xf32, #tpu.memory_space<vmem>>, vector<1x128xf32>
      tpu.vector_store %arg6[%c0_11, %c0_12], %12 {strides = array<i32>} : memref<1x128xf32, #tpu.memory_space<vmem>>, vector<1x128xf32>,
    } else {
    }
    %c0 = arith.constant 0 : index
    %c0_1 = arith.constant 0 : index
    %3 = vector.load %arg2[%c0, %c0_1] : memref<128x32xf32, #tpu.memory_space<vmem>>, vector<128x32xf32>
    %c0_2 = arith.constant 0 : index
    %c0_3 = arith.constant 0 : index
    %4 = vector.load %arg6[%c0_2, %c0_3] : memref<1x128xf32, #tpu.memory_space<vmem>>, vector<1x128xf32>
    %c0_4 = arith.constant 0 : index
    %c0_5 = arith.constant 0 : index
    %5 = vector.load %arg3[%c0_4, %c0_5] : memref<1x32xf32, #tpu.memory_space<vmem>>, vector<1x32xf32>
    %cst = arith.constant dense<0.000000e+00> : vector<1x128xf32>
    %6 = tpu.matmul %5, %3, %cst {dimension_numbers = #tpu.dot_dimension_numbers<[1], [1], [0], [0], [0, 0, 1, 0], [], []>} : vector<1x32xf32>, vector<128x32xf32>, vector<1x128xf32> -> vector<1x128xf32>
    %7 = arith.addf %4, %6 : vector<1x128xf32>
    %c0_6 = arith.constant 0 : index
    %c0_7 = arith.constant 0 : index
    %8 = vector.load %arg6[%c0_6, %c0_7] : memref<1x128xf32, #tpu.memory_space<vmem>>, vector<1x128xf32>
    tpu.vector_store %arg6[%c0_6, %c0_7], %7 {strides = array<i32>} : memref<1x128xf32, #tpu.memory_space<vmem>>, vector<1x128xf32>,
    %c0_i32_8 = arith.constant 0 : i32
    %9 = arith.cmpi eq, %arg1, %c0_i32_8 : i32
    %10 = arith.extui %9 : i1 to i32
    %c0_i32_9 = arith.constant 0 : i32
    %11 = arith.cmpi ne, %10, %c0_i32_9 : i32
    scf.if %11 {
      %c0_10 = arith.constant 0 : index
      %c0_11 = arith.constant 0 : index
      %12 = vector.load %arg6[%c0_10, %c0_11] : memref<1x128xf32, #tpu.memory_space<vmem>>, vector<1x128xf32>
      %c0_12 = arith.constant 0 : index
      %c0_13 = arith.constant 0 : index
      %13 = memref.load %arg4[%c0_12, %c0_13] : memref<1x1xf32, #tpu.memory_space<smem>>
      %14 = vector.broadcast %13 : f32 to vector<1x128xf32>
      %15 = arith.addf %12, %14 : vector<1x128xf32>
      %c0_14 = arith.constant 0 : index
      %c0_15 = arith.constant 0 : index
      %16 = vector.load %arg5[%c0_14, %c0_15] : memref<1x128xf32, #tpu.memory_space<vmem>>, vector<1x128xf32>
      tpu.vector_store %arg5[%c0_14, %c0_15], %15 {strides = array<i32>} : memref<1x128xf32, #tpu.memory_space<vmem>>, vector<1x128xf32>,
    } else {
    }
    return
  }
  func.func @transform_0(%arg0: i32, %arg1: i32) -> (i32, i32) {
    %c0_i32 = arith.constant 0 : i32
    return %arg0, %arg1 : i32, i32
  }
  func.func @transform_1(%arg0: i32, %arg1: i32) -> (i32, i32) {
    %c0_i32 = arith.constant 0 : i32
    %c0_i32_0 = arith.constant 0 : i32
    return %c0_i32, %arg1 : i32, i32
  }
  func.func @transform_2(%arg0: i32, %arg1: i32) -> (i32, i32) {
    %c0_i32 = arith.constant 0 : i32
    %c0_i32_0 = arith.constant 0 : i32
    %c0_i32_1 = arith.constant 0 : i32
    return %c0_i32, %c0_i32_0 : i32, i32
  }
  func.func @transform_3(%arg0: i32, %arg1: i32) -> (i32, i32) {
    %c0_i32 = arith.constant 0 : i32
    %c0_i32_0 = arith.constant 0 : i32
    return %c0_i32, %arg0 : i32, i32
  }
}

</mosaic_0001>

<bundles_post_ra>
// kernel: tpu_custom_call.1
= control target key start
LH: loop header
LB: loop body
LE: loop exit
PB: predicated region body
PF: predicated region fallthrough
CT: control target
= control target key end

     0   :  { %9 = vsyncpa [#allocation5], 0  ;;  %s436_s0 = inlined_call_operand.hbm [shape: f32[8,32], index: 0, kind: input, shape index: {}]   ;;  %s437_s1 = inlined_call_operand.vmem [shape: f32[1,32], index: 1, kind: input, shape index: {}]   ;;  %s438_s2 = inlined_call_operand.<no memory space> [shape: f32[1,1], index: 2, kind: input, shape index: {}]   ;;  %s439_s3 = inlined_call_operand.hbm [shape: f32[1,128], index: 3, kind: output, shape index: {}]  }
   0x1   :  { %10 = vsyncpa [#allocation6], 0 }
   0x2   :  { %15 = vsyncadd [#allocation5], 1920  ;;  %s356_s12 = smov [#allocation4]   ;;  %s308_s16 = scalar_lea.hbm %s436_s0, 128 }
   0x3   :  { %s16_s13 = sshll.u32 %s356_s12, 4  ;;  %p309_p0 = scmp.ne.s32.totalorder %s436_s0, %s308_s16  ;;  %s17_s13 = int_to_ptr.vmem [resolvable:$true] %s16_s13 }
   0x4   :  { %p312_p1 = scmp.lt.u32.totalorder %s308_s16, %s436_s0 }
   0x6   :  { %p314_p2 = pnand %p312_p1, %p309_p0 }
   0x8   :  { %317 = shalt.err (!%p314_p2)
}
   0x9   :  { %s318_s21 = scalar_lea.vmem %s17_s13, 128  ;;  %s322_s22 = scalar_lea.vmem %s17_s13, 2048 }
   0xa   :  { %p319_p3 = scmp.ne.s32.totalorder %s17_s13, %s318_s21  ;;  %p323_p4 = scmp.lt.s32.totalorder %s17_s13, %s17_s13 }
   0xb   :  { %p324_p5 = scmp.lt.s32.totalorder %s322_s22, %s318_s21 }
   0xd   :  { %p325_p6 = por %p324_p5, %p323_p4 }
   0xf   :  { %p326_p7 = pnand %p325_p6, %p319_p3 }
  0x11   :  { %329 = shalt.err (!%p326_p7)
}
  0x12   :  { %s357_s23 = smov 128   ;;  %s358_s24 = smov 8  }
  0x13   :  { %22 = dma.hbm_to_vmem [thread:$0]  %s436_s0, 128, %s17_s13, [#allocation5], %s357_s23, %s357_s23, %s358_s24  }
  0x14   :  { %352 = dma.done.wait [#allocation5], 2048  }
  0x15   :  { %353 = vsyncadd [#allocation5], 4294965248  ;;  %v359_v0 = vmov 0.0|0.0   ;;  %v360_v1 = vmov 0.0   ;;  %vm361_vm0 = vmmov 0   ;;  %vm53_vm1 = vcmask 261120  }
  0x16   :  { %269 = vmatprep.subr.bf16.mxu0 %v359_v0  ;;  %34 = vst [vmem:[#allocation2] sm:$0x1] %v360_v1  ;;  %266 = vmatprep.mubr.msk.f32.mxu0 %vm361_vm0, %v360_v1  ;;  %v35_v2 = vld [vmem:[#allocation4] sm:$0xff]  ;;  %v36_v3 = vld [vmem:[#allocation4 + $0x8] sm:$0xff]  ;;  %vm397_vm2 = vmpackc.low %vm53_vm1, %vm53_vm1  ;;  %v182_v32 = vstv %s438_s2  ;;  %s362_s30 = smov [#allocation7]  }
  0x17   :  { %v270_v5 = vpack.c.bf16 %v36_v3, %v35_v2  ;;  %v37_v6 = vld [vmem:[#allocation4 + $0x10] sm:$0xff]  ;;  %v38_v7 = vld [vmem:[#allocation4 + $0x18] sm:$0xff]  ;;  %v39_v9 = vld [vmem:[#allocation4 + $0x20] sm:$0xff]  ;;  %s191_s4 = sshll.u32 %s362_s30, 4  ;;  %s192_s4 = int_to_ptr.vmem [resolvable:$true] %s191_s4 }
  0x18   :  { %v274_v8 = vpack.c.bf16 %v38_v7, %v37_v6  ;;  %v40_v10 = vld [vmem:[#allocation4 + $0x28] sm:$0xff]  ;;  %v41_v12 = vld [vmem:[#allocation4 + $0x30] sm:$0xff]  ;;  %v42_v13 = vld [vmem:[#allocation4 + $0x38] sm:$0xff]  ;;  %s330_s5 = scalar_lea.vmem %s192_s4, 16  ;;  %p335_p9 = scmp.lt.s32.totalorder %s192_s4, %s192_s4 }
  0x19   :  { %272 = vmatpush3.bf16.xpose.msk.msra.mxu0 %vm397_vm2, %v270_v5  ;;  %v278_v11 = vpack.c.bf16 %v40_v10, %v39_v9  ;;  %v282_v14 = vpack.c.bf16 %v42_v13, %v41_v12  ;;  %v43_v15 = vld [vmem:[#allocation4 + $0x40] sm:$0xff]  ;;  %v44_v16 = vld [vmem:[#allocation4 + $0x48] sm:$0xff]  ;;  %v45_v18 = vld [vmem:[#allocation4 + $0x50] sm:$0xff]  ;;  %p331_p8 = scmp.ne.s32.totalorder %s192_s4, %s330_s5 }
  0x1a   :  { %273 = vmatprep.subr.bf16.mxu0 %v359_v0  ;;  %v286_v17 = vpack.c.bf16 %v44_v16, %v43_v15  ;;  %v46_v19 = vld [vmem:[#allocation4 + $0x58] sm:$0xff]  ;;  %v47_v21 = vld [vmem:[#allocation4 + $0x60] sm:$0xff]  ;;  %v48_v22 = vld [vmem:[#allocation4 + $0x68] sm:$0xff] }
  0x1b   :  { %v290_v20 = vpack.c.bf16 %v46_v19, %v45_v18  ;;  %v294_v23 = vpack.c.bf16 %v48_v22, %v47_v21  ;;  %v49_v24 = vld [vmem:[#allocation4 + $0x70] sm:$0xff]  ;;  %v50_v25 = vld [vmem:[#allocation4 + $0x78] sm:$0xff] }
  0x1c   :  { %v298_v26 = vpack.c.bf16 %v50_v25, %v49_v24  ;;  %v52_v27 = vld [vmem:[%s437_s1] sm:$0x1]  ;;  %s334_s1 = scalar_lea.vmem %s192_s4, 32 }
  0x1d   :  { %v51_v28 = vld [vmem:[#allocation2] sm:$0x1]  ;;  %p336_p10 = scmp.lt.s32.totalorder %s334_s1, %s330_s5 }
  0x1f   :  { %p337_p11 = por %p336_p10, %p335_p9 }
  0x21   :  { %276 = vmatpush3.bf16.xpose.msk.msra.mxu0 %vm397_vm2, %v274_v8  ;;  %p338_p12 = pnand %p337_p11, %p331_p8 }
  0x22   :  { %277 = vmatprep.subr.bf16.mxu0 %v359_v0 }
  0x29   :  { %280 = vmatpush3.bf16.xpose.msk.msra.mxu0 %vm397_vm2, %v278_v11 }
  0x2a   :  { %281 = vmatprep.subr.bf16.mxu0 %v359_v0 }
  0x31   :  { %284 = vmatpush3.bf16.xpose.msk.msra.mxu0 %vm397_vm2, %v282_v14 }
  0x32   :  { %285 = vmatprep.subr.bf16.mxu0 %v359_v0 }
  0x39   :  { %288 = vmatpush3.bf16.xpose.msk.msra.mxu0 %vm397_vm2, %v286_v17 }
  0x3a   :  { %289 = vmatprep.subr.bf16.mxu0 %v359_v0 }
  0x41   :  { %292 = vmatpush3.bf16.xpose.msk.msra.mxu0 %vm397_vm2, %v290_v20 }
  0x42   :  { %293 = vmatprep.subr.bf16.mxu0 %v359_v0 }
  0x49   :  { %296 = vmatpush3.bf16.xpose.msk.msra.mxu0 %vm397_vm2, %v294_v23 }
  0x4a   :  { %297 = vmatprep.subr.bf16.mxu0 %v359_v0 }
  0x51   :  { %300 = vmatpush3.bf16.xpose.msk.msra.mxu0 %vm397_vm2, %v298_v26 }
  0x58   :  { %267 = vmatmul.mubr.msk.f32.vlgmr.msra.gmra.mrb[0].mxu0 %vm53_vm1, %v52_v27 }
 0x12b   :  { %v171_v29 = vpop.f32.mrb[0].mxu0 }
 0x12c   :  { %v175_v30 = vadd.f32 %v171_v29, %v51_v28  ;;  %v268_v31 = vpop.f32.mrb[1].mxu0 }
 0x12e   :  { %176 = vst [vmem:[#allocation2] sm:$0x1] %v175_v30 }
 0x135   :  { %v180_v33 = vld [vmem:[#allocation2] sm:$0x1] }
 0x136   :  { %v183_v34 = vadd.f32 %v182_v32, %v180_v33 }
 0x138   :  { %184 = vst [vmem:[#allocation7] sm:$0x1] %v183_v34 }
 0x139   :  { %341 = shalt.err (!%p338_p12)
}
 0x13a   :  { %s342_s8 = scalar_lea.hbm %s439_s3, 16 }
 0x13b   :  { %p343_p13 = scmp.ne.s32.totalorder %s439_s3, %s342_s8  ;;  %p346_p0 = scmp.lt.u32.totalorder %s342_s8, %s439_s3 }
 0x13d   :  { %p348_p1 = pnand %p346_p0, %p343_p13 }
 0x13f   :  { %351 = shalt.err (!%p348_p1)
}
 0x140   :  { %194 = dma.vmem_to_hbm [thread:$0]  %s192_s4, 16, %s439_s3, [#allocation6]  }
 0x141   :  { %354 = dma.done.wait [#allocation6], 16  }
 0x142   :  { %355 = vsyncadd [#allocation6], 4294967280 }
 0x143   :  { %198 = vsyncpa [#allocation5], 1 }
 0x144   :  { %199 = vsyncpa [#allocation6], 1 }

</bundles_post_ra>
